<compile_context>
chip_gen: v6e
topology: v6e:2x2x1
jax: 0.10.0
libtpu: 0.0.40
codegen_flags: <defaults>
</compile_context>

<pallas_src>
import jax
import jax.numpy as jnp
from jax.experimental import pallas as pl
from jax.experimental.pallas import tpu as pltpu


def _cdiv(a, b):
    return -(-a // b)


def _round_up(a, b):
    return _cdiv(a, b) * b


def mlp_kernel(x_ref, w1_ref, b1_ref, w2_ref, b2_ref, o_ref):
    # In-kernel bf16 cast of the activation tile (VPU), then fc1 on the MXU
    # with f32 accumulation.
    x = x_ref[...].astype(w1_ref.dtype)                    # (TB, I) -> bf16
    h = jnp.dot(x, w1_ref[...], preferred_element_type=jnp.float32)
    # dropout == identity at inference; bias/relu/sqrt in f32 on the VPU/EUP.
    h = h + b1_ref[...]                                     # (TB, H) + (1, H)
    h = jnp.sqrt(jnp.maximum(h, 0.0))
    # fc2: (TB, H)bf16 @ (H, O_pad)bf16 -> f32 accumulate.
    out = jnp.dot(h.astype(w2_ref.dtype), w2_ref[...],
                  preferred_element_type=jnp.float32)
    out = out + b2_ref[...]                                 # (TB, O_pad) + (1, O_pad)
    o_ref[...] = out.astype(o_ref.dtype)                    # lane-dense store


def prepare_mlp_params(w1, b1, w2, b2, *, matmul_dtype=jnp.bfloat16):
    """One-time parameter prep (call at init, not per forward).

    Pads the output feature dim of fc2 up to a multiple of 128 (lane-dense
    stores) and casts matmul operands to bf16 / biases to f32.
    """
    H, O = w2.shape
    o_pad = _round_up(O, 128)
    if o_pad != O:
        w2 = jnp.pad(w2, ((0, 0), (0, o_pad - O)))
        b2 = jnp.pad(b2, ((0, 0), (0, o_pad - O)))
    return dict(
        w1=w1.astype(matmul_dtype),
        b1=b1.astype(jnp.float32),
        w2=w2.astype(matmul_dtype),
        b2=b2.astype(jnp.float32),
        out_features=O,
    )


def mlp_forward(x, params, *, tb=256, min_grid_steps=1, slice_output=True):
    """x: [B, I] (any float dtype). params: from prepare_mlp_params. -> [B, O].

    min_grid_steps: set to 2 on v7x with large B so the "parallel" batch axis
    can shard across both TensorCores (keep 1 on v5e/v6e).
    slice_output=False returns the [B_pad, O_pad] slab (skips one HBM pass) —
    padded rows/cols are exact zeros of the padded compute.
    """
    w1, b1, w2, b2 = params["w1"], params["b1"], params["w2"], params["b2"]
    out_features = params["out_features"]
    B, I = x.shape
    H, o_pad = w2.shape
    out_dtype = x.dtype

    # --- Batch tiling: fewest 8-aligned grid steps (review item 2/3/10).
    tb_r = max(8, (int(tb) // 8) * 8)                  # robust to non-8-mult tb
    n_steps = max(_cdiv(B, tb_r), int(min_grid_steps))
    n_steps = min(n_steps, max(1, _cdiv(B, 8)))        # keep tiles >= 8 rows
    tb_eff = _round_up(_cdiv(B, n_steps), 8)
    b_pad = n_steps * tb_eff
    if b_pad != B:
        x = jnp.pad(x, ((0, b_pad - B), (0, 0)))

    # --- Explicit VMEM budget from actual buffer sizes (review item 5).
    pinned_bytes = sum(int(a.size) * a.dtype.itemsize for a in (w1, b1, w2, b2))
    io_bytes = 2 * tb_eff * (I * x.dtype.itemsize
                             + o_pad * jnp.dtype(out_dtype).itemsize)
    inter_bytes = 3 * tb_eff * H * 4
    vmem_bytes = int(min(64 << 20,
                         max(16 << 20,
                             2 * pinned_bytes + io_bytes + inter_bytes + (2 << 20))))

    # Pinned (VMEM-resident across all batch tiles) specs for weights/biases.
    def pinned(shape):
        return pl.BlockSpec(shape, lambda i, _n=len(shape): (0,) * _n)

    out = pl.pallas_call(
        mlp_kernel,
        out_shape=jax.ShapeDtypeStruct((b_pad, o_pad), out_dtype),
        grid=(n_steps,),
        in_specs=[
            pl.BlockSpec((tb_eff, I), lambda i: (i, 0)),   # batch tile, pipelined
            pinned(w1.shape),
            pinned(b1.shape),
            pinned(w2.shape),
            pinned(b2.shape),
        ],
        out_specs=pl.BlockSpec((tb_eff, o_pad), lambda i: (i, 0)),
        compiler_params=pltpu.CompilerParams(
            dimension_semantics=("parallel",),
            vmem_limit_bytes=vmem_bytes,
        ),
    )(x, w1, b1, w2, b2)

    if slice_output:
        return out[:B, :out_features]
    return out


def mlp_reference(x, w1, b1, w2, b2, matmul_dtype=jnp.bfloat16):
    """Pure-JAX reference with the same bf16-matmul / f32-accumulate recipe."""
    xb, w1b, w2b = (a.astype(matmul_dtype) for a in (x, w1, w2))
    h = jnp.dot(xb, w1b, preferred_element_type=jnp.float32) + b1
    h = jnp.sqrt(jnp.maximum(h, 0.0))
    out = jnp.dot(h.astype(matmul_dtype), w2b,
                  preferred_element_type=jnp.float32) + b2
    return out.astype(x.dtype)


if __name__ == "__main__":
    # Shapes consistent with the module: MLP(input_size=32, output_size=16,
    # hidden_size=128), batch = 16.
    batch, input_size, hidden_size, output_size = 16, 32, 128, 16

    key = jax.random.PRNGKey(0)
    kx, kw1, kb1, kw2, kb2, kx2 = jax.random.split(key, 6)

    x = jax.random.normal(kx, (batch, input_size), dtype=jnp.float32)

    # Deterministic parameter init (uniform, PyTorch-Linear-style bounds).
    bound1 = 1.0 / (input_size ** 0.5)
    w1 = jax.random.uniform(kw1, (input_size, hidden_size), jnp.float32,
                            -bound1, bound1)
    b1 = jax.random.uniform(kb1, (1, hidden_size), jnp.float32, -bound1, bound1)
    bound2 = 1.0 / (hidden_size ** 0.5)
    w2 = jax.random.uniform(kw2, (hidden_size, output_size), jnp.float32,
                            -bound2, bound2)
    b2 = jax.random.uniform(kb2, (1, output_size), jnp.float32, -bound2, bound2)

    # One-time parameter prep (padding + bf16 casts hoisted out of the call).
    params = prepare_mlp_params(w1, b1, w2, b2)

    # --- Case 1: small batch -> single grid step (grid=(1,)).
    out = mlp_forward(x, params)
    out = jax.block_until_ready(out)

    ref = mlp_reference(x, w1, b1, w2, b2)
    assert out.shape == (batch, output_size)
    assert jnp.allclose(out, ref, atol=2e-2, rtol=2e-2), "mismatch vs reference"

    # Sanity vs. full-f32 math as well (looser tol due to bf16 matmul inputs).
    ref_f32 = jnp.sqrt(jnp.maximum(x @ w1 + b1, 0.0)) @ w2 + b2
    assert jnp.allclose(out, ref_f32, atol=5e-2, rtol=5e-2), "far from f32 ref"

    # --- Case 2: awkward batch (B=300) + multi-step grid to exercise the
    # batch-tiling / padding path (tb=128 -> 3 steps of 104 rows, 12 pad rows).
    batch2 = 300
    x2 = jax.random.normal(kx2, (batch2, input_size), dtype=jnp.float32)
    out2 = jax.block_until_ready(mlp_forward(x2, params, tb=128))
    ref2 = mlp_reference(x2, w1, b1, w2, b2)
    assert out2.shape == (batch2, output_size)
    assert jnp.allclose(out2, ref2, atol=2e-2, rtol=2e-2), "mismatch (B=300)"

    print("KERNEL_OK")
</pallas_src>

<mosaic_0001>
module attributes {stable_mosaic.version = 11 : i64} {
  func.func @mlp_kernel(%arg0: i32, %arg1: memref<16x32xf32, #tpu.memory_space<vmem>>, %arg2: memref<32x128xbf16, #tpu.memory_space<vmem>>, %arg3: memref<1x128xf32, #tpu.memory_space<vmem>>, %arg4: memref<128x128xbf16, #tpu.memory_space<vmem>>, %arg5: memref<1x128xf32, #tpu.memory_space<vmem>>, %arg6: memref<16x128xf32, #tpu.memory_space<vmem>>) attributes {dimension_semantics = [#tpu.dimension_semantics<parallel>], iteration_bounds = array<i64: 1>, scalar_prefetch = 0 : i64, scratch_operands = 0 : i64, tpu.core_type = #tpu.core_type<tc>, window_params = [{transform_indices = @transform_0, window_bounds = array<i64: 16, 32>}, {pipeline_mode = #tpu.pipeline_mode<synchronous>, transform_indices = @transform_1, window_bounds = array<i64: 32, 128>}, {pipeline_mode = #tpu.pipeline_mode<synchronous>, transform_indices = @transform_2, window_bounds = array<i64: 1, 128>}, {pipeline_mode = #tpu.pipeline_mode<synchronous>, transform_indices = @transform_3, window_bounds = array<i64: 128, 128>}, {pipeline_mode = #tpu.pipeline_mode<synchronous>, transform_indices = @transform_4, window_bounds = array<i64: 1, 128>}, {transform_indices = @transform_5, window_bounds = array<i64: 16, 128>}]} {
    %c0 = arith.constant 0 : index
    %c0_0 = arith.constant 0 : index
    %0 = vector.load %arg1[%c0, %c0_0] : memref<16x32xf32, #tpu.memory_space<vmem>>, vector<16x32xf32>
    %1 = arith.truncf %0 : vector<16x32xf32> to vector<16x32xbf16>
    %c0_1 = arith.constant 0 : index
    %c0_2 = arith.constant 0 : index
    %2 = vector.load %arg2[%c0_1, %c0_2] : memref<32x128xbf16, #tpu.memory_space<vmem>>, vector<32x128xbf16>
    %cst = arith.constant dense<0.000000e+00> : vector<16x128xf32>
    %3 = tpu.matmul %1, %2, %cst {dimension_numbers = #tpu.dot_dimension_numbers<[1], [0], [0], [1], [0, 0, 1, 1], [], []>} : vector<16x32xbf16>, vector<32x128xbf16>, vector<16x128xf32> -> vector<16x128xf32>
    %c0_3 = arith.constant 0 : index
    %c0_4 = arith.constant 0 : index
    %4 = vector.load %arg3[%c0_3, %c0_4] : memref<1x128xf32, #tpu.memory_space<vmem>>, vector<1x128xf32>
    %5 = vector.broadcast %4 : vector<1x128xf32> to vector<16x128xf32>
    %6 = arith.addf %3, %5 : vector<16x128xf32>
    %cst_5 = arith.constant 0.000000e+00 : f32
    %7 = vector.broadcast %cst_5 : f32 to vector<16x128xf32>
    %8 = arith.maximumf %6, %7 : vector<16x128xf32>
    %9 = math.sqrt %8 : vector<16x128xf32>
    %10 = arith.truncf %9 : vector<16x128xf32> to vector<16x128xbf16>
    %c0_6 = arith.constant 0 : index
    %c0_7 = arith.constant 0 : index
    %11 = vector.load %arg4[%c0_6, %c0_7] : memref<128x128xbf16, #tpu.memory_space<vmem>>, vector<128x128xbf16>
    %cst_8 = arith.constant dense<0.000000e+00> : vector<16x128xf32>
    %12 = tpu.matmul %10, %11, %cst_8 {dimension_numbers = #tpu.dot_dimension_numbers<[1], [0], [0], [1], [0, 0, 1, 1], [], []>} : vector<16x128xbf16>, vector<128x128xbf16>, vector<16x128xf32> -> vector<16x128xf32>
    %c0_9 = arith.constant 0 : index
    %c0_10 = arith.constant 0 : index
    %13 = vector.load %arg5[%c0_9, %c0_10] : memref<1x128xf32, #tpu.memory_space<vmem>>, vector<1x128xf32>
    %14 = vector.broadcast %13 : vector<1x128xf32> to vector<16x128xf32>
    %15 = arith.addf %12, %14 : vector<16x128xf32>
    %c0_11 = arith.constant 0 : index
    %c0_12 = arith.constant 0 : index
    %16 = vector.load %arg6[%c0_11, %c0_12] : memref<16x128xf32, #tpu.memory_space<vmem>>, vector<16x128xf32>
    tpu.vector_store %arg6[%c0_11, %c0_12], %15 {strides = array<i32>} : memref<16x128xf32, #tpu.memory_space<vmem>>, vector<16x128xf32>,
    return
  }
  func.func @transform_0(%arg0: i32) -> (i32, i32) {
    %c0_i32 = arith.constant 0 : i32
    %c0_i32_0 = arith.constant 0 : i32
    return %arg0, %c0_i32 : i32, i32
  }
  func.func @transform_1(%arg0: i32) -> (i32, i32) {
    %c0_i32 = arith.constant 0 : i32
    %c0_i32_0 = arith.constant 0 : i32
    %c0_i32_1 = arith.constant 0 : i32
    return %c0_i32, %c0_i32_0 : i32, i32
  }
  func.func @transform_2(%arg0: i32) -> (i32, i32) {
    %c0_i32 = arith.constant 0 : i32
    %c0_i32_0 = arith.constant 0 : i32
    %c0_i32_1 = arith.constant 0 : i32
    return %c0_i32, %c0_i32_0 : i32, i32
  }
  func.func @transform_3(%arg0: i32) -> (i32, i32) {
    %c0_i32 = arith.constant 0 : i32
    %c0_i32_0 = arith.constant 0 : i32
    %c0_i32_1 = arith.constant 0 : i32
    return %c0_i32, %c0_i32_0 : i32, i32
  }
  func.func @transform_4(%arg0: i32) -> (i32, i32) {
    %c0_i32 = arith.constant 0 : i32
    %c0_i32_0 = arith.constant 0 : i32
    %c0_i32_1 = arith.constant 0 : i32
    return %c0_i32, %c0_i32_0 : i32, i32
  }
  func.func @transform_5(%arg0: i32) -> (i32, i32) {
    %c0_i32 = arith.constant 0 : i32
    %c0_i32_0 = arith.constant 0 : i32
    return %arg0, %c0_i32 : i32, i32
  }
}

</mosaic_0001>

<bundles_post_ra>
// kernel: tpu_custom_call.1
= control target key start
LH: loop header
LB: loop body
LE: loop exit
PB: predicated region body
PF: predicated region fallthrough
CT: control target
= control target key end

     0   :  { %10 = vsyncpa [#allocation3], 0  ;;  %s510_s0 = inlined_call_operand.hbm [shape: f32[16,32], index: 0, kind: input, shape index: {}]   ;;  %s511_s1 = inlined_call_operand.hbm [shape: bf16[32,128], index: 1, kind: input, shape index: {}]   ;;  %s512_s2 = inlined_call_operand.vmem [shape: f32[1,128], index: 2, kind: input, shape index: {}]   ;;  %s513_s3 = inlined_call_operand.hbm [shape: bf16[128,128], index: 3, kind: input, shape index: {}]   ;;  %s514_s4 = inlined_call_operand.vmem [shape: f32[1,128], index: 4, kind: input, shape index: {}]   ;;  %s515_s5 = inlined_call_operand.hbm [shape: f32[16,128], index: 5, kind: output, shape index: {}]  }
   0x1   :  { %11 = vsyncpa [#allocation6], 0 }
   0x2   :  { %12 = vsyncpa [#allocation4], 0  ;;  %s446_s18 = smov [#allocation5]  }
   0x3   :  { %s30_s19 = sshll.u32 %s446_s18, 4  ;;  %s31_s19 = int_to_ptr.vmem [resolvable:$true] %s30_s19 }
   0x4   :  { %s368_s20 = scalar_lea.vmem %s31_s19, 256  ;;  %p373_p1 = scmp.lt.s32.totalorder %s31_s19, %s31_s19 }
   0x5   :  { %p369_p0 = scmp.ne.s32.totalorder %s31_s19, %s368_s20  ;;  %p374_p2 = scmp.lt.s32.totalorder %s368_s20, %s368_s20 }
   0x7   :  { %p375_p3 = por %p374_p2, %p373_p1 }
   0x9   :  { %p376_p4 = pnand %p375_p3, %p369_p0 }
   0xb   :  { %379 = shalt.err (!%p376_p4)
}
   0xc   :  { %s447_s21 = smov 64   ;;  %s448_s22 = smov 4  }
   0xd   :  { %36 = dma.hbm_to_vmem [thread:$0]  %s511_s1, 256, %s31_s19, [#allocation6], %s447_s21, %s447_s21, %s448_s22  }
   0xe   :  { %s449_s25 = smov [#allocation2]  }
   0xf   :  { %s18_s26 = sshll.u32 %s449_s25, 4  ;;  %s19_s26 = int_to_ptr.vmem [resolvable:$true] %s18_s26 }
  0x10   :  { %s388_s27 = scalar_lea.vmem %s19_s26, 256  ;;  %p393_p6 = scmp.lt.s32.totalorder %s19_s26, %s19_s26 }
  0x11   :  { %p389_p5 = scmp.ne.s32.totalorder %s19_s26, %s388_s27  ;;  %p394_p7 = scmp.lt.s32.totalorder %s388_s27, %s388_s27 }
  0x13   :  { %p395_p8 = por %p394_p7, %p393_p6 }
  0x15   :  { %p396_p9 = pnand %p395_p8, %p389_p5 }
  0x17   :  { %399 = shalt.err (!%p396_p9)
}
  0x18   :  { %s450_s28 = smov 128   ;;  %s451_s29 = smov 8  }
  0x19   :  { %24 = dma.hbm_to_vmem [thread:$0]  %s510_s0, 256, %s19_s26, [#allocation3], %s450_s28, %s450_s28, %s451_s29  }
  0x1a   :  { %s452_s1 = smov [#allocation7]  }
  0x1b   :  { %s44_s7 = sshll.u32 %s452_s1, 4  ;;  %s45_s7 = int_to_ptr.vmem [resolvable:$true] %s44_s7 }
  0x1c   :  { %s408_s8 = scalar_lea.vmem %s45_s7, 1024  ;;  %p413_p11 = scmp.lt.s32.totalorder %s45_s7, %s45_s7 }
  0x1d   :  { %p409_p10 = scmp.ne.s32.totalorder %s45_s7, %s408_s8  ;;  %p414_p12 = scmp.lt.s32.totalorder %s408_s8, %s408_s8 }
  0x1f   :  { %p415_p13 = por %p414_p12, %p413_p11 }
  0x21   :  { %p416_p0 = pnand %p415_p13, %p409_p10 }
  0x23   :  { %419 = shalt.err (!%p416_p0)
}
  0x24   :  { %50 = dma.hbm_to_vmem [thread:$0]  %s513_s3, 1024, %s45_s7, [#allocation6], %s447_s21, %s447_s21, %s448_s22  }
  0x25   :  { %440 = dma.done.wait [#allocation3], 256  }
  0x26   :  { %441 = vsyncadd [#allocation3], 4294967040 }
  0x27   :  { %442 = dma.done.wait [#allocation6], 1280  }
  0x28   :  { %443 = vsyncadd [#allocation6], 4294966016  ;;  %v453_v0 = vmov 0.0   ;;  %vm454_vm0 = vmmov 0   ;;  %v346_v1 = vld [vmem:[#allocation5 + $0x8] sm:$0xff]   ;;  %v347_v2 = vld [vmem:[#allocation5] sm:$0xff]  }
  0x29   :  { %308 = vmatprep.subr.bf16.mxu0 %v453_v0  ;;  %312 = vmatprep.mubr.msk.bf16.mxu0 %vm454_vm0, %v453_v0  ;;  %v63_v3 = vld [vmem:[#allocation2] sm:$0xff]  ;;  %v64_v4 = vld [vmem:[#allocation2 + $0x8] sm:$0xff]  ;;  %vm89_vm1 = vcmask 261120   ;;  %v348_v5 = vld [vmem:[#allocation7 + $0x38] sm:$0xff]   ;;  %s455_s12 = smov [#allocation8]  }
  0x2a   :  { %316 = vmatprep.subr.bf16.mxu1 %v453_v0  ;;  %332 = vmatprep.mubr.msk.bf16.mxu1 %vm454_vm0, %v453_v0  ;;  %v65_v6 = vpack.c.bf16 %v64_v4, %v63_v3  ;;  %v349_v7 = vld [vmem:[#allocation7 + $0x30] sm:$0xff]   ;;  %v350_v8 = vld [vmem:[#allocation7 + $0x28] sm:$0xff]   ;;  %v351_v9 = vld [vmem:[#allocation7 + $0x20] sm:$0xff]   ;;  %s270_s13 = sshll.u32 %s455_s12, 4  ;;  %s271_s13 = int_to_ptr.vmem [resolvable:$true] %s270_s13 }
  0x2b   :  { %309 = vmatpush3.bf16.msra.mxu0 %v346_v1  ;;  %317 = vmatpush3.bf16.msra.mxu1 %v348_v5  ;;  %v352_v10 = vld [vmem:[#allocation7 + $0x18] sm:$0xff]   ;;  %v353_v11 = vld [vmem:[#allocation7 + $0x10] sm:$0xff]   ;;  %v354_v12 = vld [vmem:[#allocation7 + $0x8] sm:$0xff]   ;;  %s420_s14 = scalar_lea.vmem %s271_s13, 256  ;;  %p425_p2 = scmp.lt.s32.totalorder %s271_s13, %s271_s13 }
  0x2c   :  { %310 = vmatprep.subr.bf16.mxu0 %v453_v0  ;;  %318 = vmatprep.subr.bf16.mxu1 %v453_v0  ;;  %v355_v13 = vld [vmem:[#allocation7] sm:$0xff]   ;;  %p421_p1 = scmp.ne.s32.totalorder %s271_s13, %s420_s14  ;;  %p426_p3 = scmp.lt.s32.totalorder %s420_s14, %s420_s14 }
  0x2d   :  { %v283_v14 = vld [vmem:[%s512_s2] ss:$0 sm:$0xff] }
  0x2e   :  { %v287_v34 = vld [vmem:[%s514_s4] ss:$0 sm:$0xff]  ;;  %p427_p4 = por %p426_p3, %p425_p2 }
  0x2f   :  { %311 = vmatpush3.bf16.msra.mxu0 %v347_v2  ;;  %319 = vmatpush3.bf16.msra.mxu1 %v349_v7 }
  0x30   :  { %320 = vmatprep.subr.bf16.mxu1 %v453_v0  ;;  %p428_p5 = pnand %p427_p4, %p421_p1 }
  0x32   :  { %313 = vmatmul.mubr.msk.bf16.vlgmr.msra.gmra.mxu0 %vm89_vm1, %v65_v6 }
  0x33   :  { %321 = vmatpush3.bf16.msra.mxu1 %v350_v8 }
  0x34   :  { %322 = vmatprep.subr.bf16.mxu1 %v453_v0 }
  0x37   :  { %323 = vmatpush3.bf16.msra.mxu1 %v351_v9 }
  0x38   :  { %324 = vmatprep.subr.bf16.mxu1 %v453_v0 }
  0x3b   :  { %325 = vmatpush3.bf16.msra.mxu1 %v352_v10 }
  0x3c   :  { %326 = vmatprep.subr.bf16.mxu1 %v453_v0 }
  0x3f   :  { %327 = vmatpush3.bf16.msra.mxu1 %v353_v11 }
  0x40   :  { %328 = vmatprep.subr.bf16.mxu1 %v453_v0 }
  0x43   :  { %329 = vmatpush3.bf16.msra.mxu1 %v354_v12 }
  0x44   :  { %330 = vmatprep.subr.bf16.mxu1 %v453_v0 }
  0x47   :  { %331 = vmatpush3.bf16.msra.mxu1 %v355_v13 }
  0xf2   :  { %v127_v15 = vpop.f32.mrf.mxu0 }
  0xf3   :  { %v128_v16 = vadd.f32 %v283_v14, %v127_v15 }
  0xf4   :  { %v314_v17 = vpop.f32.mrf.mxu0 }
  0xf5   :  { %v134_v18 = vmax.f32 %v128_v16, 0.0 }
  0xf6   :  { %v130_v19 = vpop.f32.mrf.mxu0 }
  0xf7   :  { %356 = vrsqrt.f32 %v134_v18  ;;  %v131_v20 = vadd.f32 %v283_v14, %v130_v19  ;;  %vm138_vm2 = vcmp.eq.f32.partialorder %v134_v18, inf  ;;  %v141_v28 = vand.u32 2147483648, %v134_v18 }
  0xf8   :  { %v315_v21 = vpop.f32.mrf.mxu0  ;;  %vm140_vm4 = vcmp.eq.f32.partialorder %v134_v18, 0.0 }
  0xf9   :  { %v135_v22 = vmax.f32 %v131_v20, 0.0 }
  0xfb   :  { %358 = vrsqrt.f32 %v135_v22  ;;  %vm145_vm3 = vcmp.eq.f32.partialorder %v135_v22, inf  ;;  %v148_v29 = vand.u32 2147483648, %v135_v22  ;;  %vm147_vm5 = vcmp.eq.f32.partialorder %v135_v22, 0.0 }
 0x104   :  { %v357_v23 = vpop.eup %356 }
 0x105   :  { %v137_v24 = vmul.f32 %v357_v23, %v134_v18 }
 0x107   :  { %v139_v26 = vsel %vm138_vm2, %v134_v18, %v137_v24 }
 0x108   :  { %v359_v25 = vpop.eup %358  ;;  %v142_v31 = vsel %vm140_vm4, %v141_v28, %v139_v26 }
 0x109   :  { %v144_v27 = vmul.f32 %v359_v25, %v135_v22 }
 0x10b   :  { %v146_v30 = vsel %vm145_vm3, %v135_v22, %v144_v27 }
 0x10c   :  { %v149_v32 = vsel %vm147_vm5, %v148_v29, %v146_v30 }
 0x10d   :  { %v150_v33 = vpack.c.bf16 %v149_v32, %v142_v31 }
 0x10f   :  { %333 = vmatmul.mubr.bf16.vlgmr.msra.gmra.mxu1 %v150_v33 }
 0x1cf   :  { %v256_v35 = vpop.f32.mrf.mxu1 }
 0x1d0   :  { %v257_v36 = vadd.f32 %v287_v34, %v256_v35 }
 0x1d1   :  { %v334_v37 = vpop.f32.mrf.mxu1 }
 0x1d2   :  { %263 = vst [vmem:[#allocation8] sm:$0xff] %v257_v36 }
 0x1d3   :  { %v259_v38 = vpop.f32.mrf.mxu1 }
 0x1d4   :  { %v260_v39 = vadd.f32 %v287_v34, %v259_v38 }
 0x1d5   :  { %v335_v40 = vpop.f32.mrf.mxu1 }
 0x1d6   :  { %264 = vst [vmem:[#allocation8 + $0x8] sm:$0xff] %v260_v39 }
 0x1d7   :  { %431 = shalt.err (!%p428_p5)
}
 0x1d8   :  { %276 = dma.vmem_to_hbm [thread:$0]  %s271_s13, 256, %s515_s5, [#allocation4], %s450_s28, %s450_s28, %s451_s29  }
 0x1d9   :  { %444 = dma.done.wait [#allocation4], 256  }
 0x1da   :  { %445 = vsyncadd [#allocation4], 4294967040 }
 0x1db   :  { %280 = vsyncpa [#allocation3], 1 }
 0x1dc   :  { %281 = vsyncpa [#allocation6], 1 }
 0x1dd   :  { %282 = vsyncpa [#allocation4], 1 }

</bundles_post_ra>
